<compile_context>
chip_gen: v5e
topology: v5e:2x2
jax: 0.10.0
libtpu: 0.0.40
codegen_flags: <defaults>
</compile_context>

<pallas_src>
import functools

import numpy as np
import jax
import jax.numpy as jnp
from jax import lax
from jax.experimental import pallas as pl
from jax.experimental.pallas import tpu as pltpu


# --------------------------------------------------------------------------- #
# Pallas kernel: one grid step == one independent loss instance.               #
# --------------------------------------------------------------------------- #
def _loss_kernel(labels_smem,            # scalar-prefetch: (N, B) int32 in SMEM
                 feat_ref,               # (B, D) f32   features (backbone output)
                 proto0_ref,             # (C, D) f32   prototypes at entry
                 ld_ref,                 # (B, 2) int32 [:,0]=labels  [:,1]=domains
                 losses_ref,             # (1, 3) f32 out: [total, loss_dis, loss_comp]
                 pred_ref,               # (B, 1) int32 out
                 proto_ref,              # (C, D) f32 out: updated prototypes
                 *, temperature, base_temperature, proto_m, w, use_domain,
                 num_domains):
    f32 = jnp.float32
    inst = pl.program_id(0)

    feats = feat_ref[...]                                    # (B, D)
    proto0 = proto0_ref[...]                                 # (C, D)
    B, D = feats.shape
    C = proto0.shape[0]
    inv_t = 1.0 / temperature
    scale = temperature / base_temperature
    dn = (((1,), (1,)), ((), ()))                            # contract last dims: A @ B.T

    # ----- pred: argmax of (features @ prototypes(initial).T / T) ----------- #
    fdp0 = lax.dot_general(feats, proto0, dn, preferred_element_type=f32) * inv_t  # (B, C)
    cls_row = lax.broadcasted_iota(jnp.int32, (B, C), 1)
    row_max0 = jnp.max(fdp0, axis=1, keepdims=True)
    pred_ref[...] = jnp.min(jnp.where(fdp0 >= row_max0, cls_row, C),
                            axis=1, keepdims=True)

    # ----- DisLoss: sequential EMA prototype update (vreg-resident) --------- #
    protos = proto0                                          # carried as a value
    f_scaled = feats * (1.0 - proto_m)                       # hoisted out of loop
    cls_col = lax.broadcasted_iota(jnp.int32, (C, 1), 0)     # (C, 1)
    for j in range(B):                                       # B static -> unrolled
        lbl = labels_smem[inst, j]                           # SMEM scalar
        v = protos * proto_m + f_scaled[j:j + 1, :]          # (C, D); only row lbl kept
        ss = jnp.sum(v * v, axis=1, keepdims=True)
        v = v * lax.rsqrt(jnp.maximum(ss, 1e-24))            # == v / max(||v||, 1e-12)
        protos = jnp.where(cls_col == lbl, v, protos)        # one-hot row blend
    proto_ref[...] = protos                                  # single store after loop

    # ----- DisLoss: dispersion over updated prototypes (C > 1 statically) --- #
    dis_logits = lax.dot_general(protos, protos, dn, preferred_element_type=f32) * inv_t
    diag = (lax.broadcasted_iota(jnp.int32, (C, C), 0)
            == lax.broadcasted_iota(jnp.int32, (C, C), 1))
    num = jnp.sum(jnp.where(diag, 0.0, jnp.exp(dis_logits)), axis=1, keepdims=True)
    mean_prob_neg = jnp.log(num) - float(np.log(C - 1))      # denominator == C-1
    loss_dis = scale * jnp.mean(mean_prob_neg)

    # ----- CompLoss ---------------------------------------------------------- #
    lcol = ld_ref[:, 0:1]                                    # (B, 1) labels
    cmask = (lcol == cls_row).astype(f32)                    # (B, C) one-hot
    pn2 = jnp.sum(protos * protos, axis=1, keepdims=True)
    protos_n = protos * lax.rsqrt(jnp.maximum(pn2, 1e-24))   # F.normalize(dim=1)
    fdp = lax.dot_general(feats, protos_n, dn, preferred_element_type=f32) * inv_t  # (B, C)

    if use_domain:
        dcol = ld_ref[:, 1:2]                                # (B, 1) domains
        fdf = lax.dot_general(feats, feats, dn, preferred_element_type=f32) * inv_t  # (B, B)
        # (B,B) equality masks from one-hots: (onehot @ onehot.T)[i,j] = 1[x_i == x_j]
        label_mask = lax.dot_general(cmask, cmask, dn, preferred_element_type=f32)
        dom_ids = lax.broadcasted_iota(jnp.int32, (B, num_domains), 1)
        d1h = (dcol == dom_ids).astype(f32)
        domain_mask = lax.dot_general(d1h, d1h, dn, preferred_element_type=f32)
        neg_label_pos_domain = (1.0 - label_mask) * domain_mask
        logits_max = jnp.max(fdf, axis=1, keepdims=True)     # faithful: max over feat logits
        prot_logits = fdp - logits_max
        feat_logits = fdf - logits_max
        pos_part = jnp.sum(prot_logits * cmask, axis=1, keepdims=True)
        prot_neg = jnp.sum(jnp.exp(prot_logits), axis=1, keepdims=True)
        same_dom = jnp.sum(neg_label_pos_domain * jnp.exp(feat_logits),
                           axis=1, keepdims=True)
        neg_part = jnp.log(prot_neg + same_dom + 1e-8)
        loss_comp = -scale * jnp.mean(pos_part - neg_part)
    else:
        logits_max = jnp.max(fdp, axis=1, keepdims=True)
        logits = fdp - logits_max
        log_prob = logits - jnp.log(jnp.sum(jnp.exp(logits), axis=1, keepdims=True))
        loss_comp = -scale * jnp.mean(jnp.sum(cmask * log_prob, axis=1, keepdims=True))

    # ----- pack the three scalar losses into the (1, 3) output block -------- #
    total = loss_dis + w * loss_comp
    lane3 = lax.broadcasted_iota(jnp.int32, (1, 3), 1)
    losses_ref[...] = (jnp.where(lane3 == 0, total, 0.0)
                       + jnp.where(lane3 == 1, loss_dis, 0.0)
                       + jnp.where(lane3 == 2, loss_comp, 0.0))


# --------------------------------------------------------------------------- #
# Wrappers                                                                     #
# --------------------------------------------------------------------------- #
def loss_forward_batched(features, proto_init, labels, domains, *, temperature,
                         base_temperature, proto_m, w, use_domain,
                         num_domains=None):
    """N independent loss instances on one grid.

    features: (N, B, D)   proto_init: (N, C, D)   labels/domains: (N, B)
    Returns (total (N,), pred (N, B), loss_dis (N,), loss_comp (N,),
             proto_new (N, C, D)).
    """
    features = jnp.asarray(features, jnp.float32)
    proto_init = jnp.asarray(proto_init, jnp.float32)
    N, B, D = features.shape
    C = proto_init.shape[1]
    if C < 2:
        raise ValueError("Dispersion loss needs num_classes >= 2")

    labels_i32 = jnp.asarray(labels, jnp.int32)               # (N, B)
    domains_i32 = jnp.asarray(domains, jnp.int32)             # (N, B)
    ld = jnp.stack([labels_i32, domains_i32], axis=-1)        # (N, B, 2)

    if use_domain:
        if num_domains is None:
            num_domains = int(jnp.max(domains_i32)) + 1       # pass explicitly under jit
        nd = max(int(num_domains), 8)                         # one-hot width (>= needed)
    else:
        nd = 8

    kernel = functools.partial(
        _loss_kernel,
        temperature=float(temperature),
        base_temperature=float(base_temperature),
        proto_m=float(proto_m),
        w=float(w),
        use_domain=bool(use_domain),
        num_domains=nd)

    grid_spec = pltpu.PrefetchScalarGridSpec(
        num_scalar_prefetch=1,            # labels -> SMEM (drives the EMA row select)
        grid=(N,),
        in_specs=[
            pl.BlockSpec((None, B, D), lambda i, lbl: (i, 0, 0)),   # features
            pl.BlockSpec((None, C, D), lambda i, lbl: (i, 0, 0)),   # prototypes (initial)
            pl.BlockSpec((None, B, 2), lambda i, lbl: (i, 0, 0)),   # labels/domains cols
        ],
        out_specs=(
            pl.BlockSpec((None, 1, 3), lambda i, lbl: (i, 0, 0)),   # [total, dis, comp]
            pl.BlockSpec((None, B, 1), lambda i, lbl: (i, 0, 0)),   # pred
            pl.BlockSpec((None, C, D), lambda i, lbl: (i, 0, 0)),   # updated prototypes
        ),
    )

    losses, pred, proto_new = pl.pallas_call(
        kernel,
        out_shape=(jax.ShapeDtypeStruct((N, 1, 3), jnp.float32),
                   jax.ShapeDtypeStruct((N, B, 1), jnp.int32),
                   jax.ShapeDtypeStruct((N, C, D), jnp.float32)),
        grid_spec=grid_spec,
        compiler_params=pltpu.CompilerParams(
            dimension_semantics=("parallel",)),   # v7x: split instances over 2 TCs
    )(labels_i32, features, proto_init, ld)

    total = losses[:, 0, 0]
    loss_dis = losses[:, 0, 1]
    loss_comp = losses[:, 0, 2]
    return total, pred[..., 0], loss_dis, loss_comp, proto_new


def loss_forward(features, proto_init, labels, domains, **kw):
    """Single-instance convenience wrapper (adds/strips the instance axis)."""
    total, pred, loss_dis, loss_comp, proto_new = loss_forward_batched(
        features[None], proto_init[None], labels[None], domains[None], **kw)
    return total[0], pred[0], loss_dis[0], loss_comp[0], proto_new[0]


# --------------------------------------------------------------------------- #
# Pure-numpy reference mirroring the PyTorch semantics (sanity check).          #
# --------------------------------------------------------------------------- #
def reference_forward(features, proto0, labels, domains, *, temperature,
                      base_temperature, proto_m, w, use_domain):
    features = np.asarray(features, np.float32)
    protos = np.asarray(proto0, np.float32).copy()
    labels = np.asarray(labels)
    domains = np.asarray(domains)
    B, _ = features.shape
    C = protos.shape[0]
    T, bT = temperature, base_temperature

    fdp0 = features @ protos.T / T
    pred = (fdp0 - fdp0.max(axis=1, keepdims=True)).argmax(axis=1)

    for j in range(B):
        l = int(labels[j])
        v = protos[l] * proto_m + features[j] * (1.0 - proto_m)
        protos[l] = v / max(float(np.linalg.norm(v)), 1e-12)

    logits = protos @ protos.T / T
    mask = 1.0 - np.eye(C, dtype=np.float32)
    mean_prob_neg = np.log((mask * np.exp(logits)).sum(1) / mask.sum(1))
    mean_prob_neg = mean_prob_neg[~np.isnan(mean_prob_neg)]
    loss_dis = T / bT * mean_prob_neg.mean()

    pr = protos / np.maximum(np.linalg.norm(protos, axis=1, keepdims=True), 1e-12)
    cmask = (labels[:, None] == np.arange(C)[None, :]).astype(np.float32)
    fdp = features @ pr.T / T
    if use_domain:
        fdf = features @ features.T / T
        label_mask = (labels[:, None] == labels[None, :]).astype(np.float32)
        domain_mask = (domains[:, None] == domains[None, :]).astype(np.float32)
        nlpd = (1.0 - label_mask) * domain_mask
        logits_max = fdf.max(axis=1, keepdims=True)
        prot_logits = fdp - logits_max
        feat_logits = fdf - logits_max
        pos_part = (prot_logits * cmask).sum(1, keepdims=True)
        prot_neg = np.exp(prot_logits).sum(1, keepdims=True)
        same_dom = (nlpd * np.exp(feat_logits)).sum(1, keepdims=True)
        neg_part = np.log(prot_neg + same_dom + 1e-8)
        loss_comp = -(T / bT) * (pos_part - neg_part).mean()
    else:
        lm = fdp.max(axis=1, keepdims=True)
        lg = fdp - lm
        log_prob = lg - np.log(np.exp(lg).sum(1, keepdims=True))
        loss_comp = -(T / bT) * (cmask * log_prob).sum(1).mean()

    return loss_dis + w * loss_comp, pred, loss_dis, loss_comp


# --------------------------------------------------------------------------- #
if __name__ == "__main__":
    # args: num_classes=8, feat_dim=32, temperature=0.1, base_temperature=0.1,
    #       proto_m=0.95, w=2.0; N=4 independent per-layer loss instances.
    N, B, IN_DIM, D, C = 4, 8, 64, 32, 8
    T, BASE_T, PROTO_M, W, USE_DOMAIN = 0.1, 0.1, 0.95, 2.0, True
    NUM_DOMAINS = 3

    key = jax.random.PRNGKey(0)
    k1, k2, k3, k4, k5 = jax.random.split(key, 5)

    x = jax.random.normal(k1, (N, B, IN_DIM), jnp.float32)
    w_net = jax.random.normal(k2, (N, IN_DIM, D), jnp.float32) / jnp.sqrt(IN_DIM)
    labels = jax.random.randint(k3, (N, B), 0, C)
    domains = jax.random.randint(k4, (N, B), 0, NUM_DOMAINS)

    # Synthetic backbone `net(input)` per instance (plain JAX glue; the real
    # backbone is external to the Loss module).
    def net(inp, wn):
        f = inp @ wn
        return f / jnp.maximum(jnp.linalg.norm(f, axis=-1, keepdims=True), 1e-12)

    features = jax.vmap(net)(x, w_net)                       # (N, B, D)

    # DisLoss.init_class_prototypes: deterministic synthetic "loader" — class-average
    # of backbone features, L2-normalized (plain JAX glue, init-time only).
    x_init = jax.random.normal(k5, (N, 4 * C, IN_DIM), jnp.float32)
    y_init = jnp.tile(jnp.arange(C), 4)                      # (4C,)
    f_init = jax.vmap(net)(x_init, w_net)                    # (N, 4C, D)
    onehot = (y_init[:, None] == jnp.arange(C)[None, :]).astype(jnp.float32)
    proto0 = jnp.einsum('kc,nkd->ncd', onehot, f_init) / onehot.sum(0)[None, :, None]
    proto0 = proto0 / jnp.maximum(jnp.linalg.norm(proto0, axis=-1, keepdims=True), 1e-12)

    total, pred, loss_dis, loss_comp, proto_new = loss_forward_batched(
        features, proto0, labels, domains,
        temperature=T, base_temperature=BASE_T, proto_m=PROTO_M, w=W,
        use_domain=USE_DOMAIN, num_domains=NUM_DOMAINS)
    jax.block_until_ready((total, pred, loss_dis, loss_comp, proto_new))

    # sanity check against a faithful numpy reference, per instance
    for n in range(N):
        rt, rp, rd, rc = reference_forward(
            np.asarray(features[n]), np.asarray(proto0[n]),
            np.asarray(labels[n]), np.asarray(domains[n]),
            temperature=T, base_temperature=BASE_T, proto_m=PROTO_M, w=W,
            use_domain=USE_DOMAIN)
        np.testing.assert_allclose(np.asarray(total[n]), rt, rtol=2e-3, atol=2e-3)
        np.testing.assert_allclose(np.asarray(loss_dis[n]), rd, rtol=2e-3, atol=2e-3)
        np.testing.assert_allclose(np.asarray(loss_comp[n]), rc, rtol=2e-3, atol=2e-3)
        assert np.array_equal(np.asarray(pred[n]), rp)

    # also exercise the no-domain CompLoss branch
    total2, pred2, dis2, comp2, _ = loss_forward_batched(
        features, proto0, labels, domains,
        temperature=T, base_temperature=BASE_T, proto_m=PROTO_M, w=W,
        use_domain=False)
    jax.block_until_ready(total2)
    for n in range(N):
        rt, rp, rd, rc = reference_forward(
            np.asarray(features[n]), np.asarray(proto0[n]),
            np.asarray(labels[n]), np.asarray(domains[n]),
            temperature=T, base_temperature=BASE_T, proto_m=PROTO_M, w=W,
            use_domain=False)
        np.testing.assert_allclose(np.asarray(dis2[n]), rd, rtol=2e-3, atol=2e-3)
        np.testing.assert_allclose(np.asarray(comp2[n]), rc, rtol=2e-3, atol=2e-3)

    print("KERNEL_OK")
</pallas_src>

<mosaic_0001>
module attributes {stable_mosaic.version = 11 : i64} {
  func.func @_loss_kernel(%arg0: i32, %arg1: memref<4x8xi32, #tpu.memory_space<smem>>, %arg2: memref<1x8x32xf32, #tpu.memory_space<vmem>>, %arg3: memref<1x8x32xf32, #tpu.memory_space<vmem>>, %arg4: memref<1x8x2xi32, #tpu.memory_space<vmem>>, %arg5: memref<1x1x3xf32, #tpu.memory_space<vmem>>, %arg6: memref<1x8x1xi32, #tpu.memory_space<vmem>>, %arg7: memref<1x8x32xf32, #tpu.memory_space<vmem>>) attributes {dimension_semantics = [#tpu.dimension_semantics<parallel>], iteration_bounds = array<i64: 4>, scalar_prefetch = 1 : i64, scratch_operands = 0 : i64, tpu.core_type = #tpu.core_type<tc>, window_params = [{transform_indices = @transform_0, window_bounds = array<i64: 1, 8, 32>}, {transform_indices = @transform_1, window_bounds = array<i64: 1, 8, 32>}, {transform_indices = @transform_2, window_bounds = array<i64: 1, 8, 2>}, {transform_indices = @transform_3, window_bounds = array<i64: 1, 1, 3>}, {transform_indices = @transform_4, window_bounds = array<i64: 1, 8, 1>}, {transform_indices = @transform_5, window_bounds = array<i64: 1, 8, 32>}]} {
    %c0 = arith.constant 0 : index
    %c0_0 = arith.constant 0 : index
    %c0_1 = arith.constant 0 : index
    %0 = vector.load %arg2[%c0, %c0_0, %c0_1] : memref<1x8x32xf32, #tpu.memory_space<vmem>>, vector<1x8x32xf32>
    %1 = vector.shape_cast %0 : vector<1x8x32xf32> to vector<8x32xf32>
    %c0_2 = arith.constant 0 : index
    %c0_3 = arith.constant 0 : index
    %c0_4 = arith.constant 0 : index
    %2 = vector.load %arg3[%c0_2, %c0_3, %c0_4] : memref<1x8x32xf32, #tpu.memory_space<vmem>>, vector<1x8x32xf32>
    %3 = vector.shape_cast %2 : vector<1x8x32xf32> to vector<8x32xf32>
    %cst = arith.constant dense<0.000000e+00> : vector<8x8xf32>
    %4 = tpu.matmul %1, %3, %cst {dimension_numbers = #tpu.dot_dimension_numbers<[1], [1], [0], [0], [0, 0, 1, 0], [], []>} : vector<8x32xf32>, vector<8x32xf32>, vector<8x8xf32> -> vector<8x8xf32>
    %cst_5 = arith.constant 1.000000e+01 : f32
    %5 = vector.broadcast %cst_5 : f32 to vector<8x8xf32>
    %6 = arith.mulf %4, %5 : vector<8x8xf32>
    %7 = tpu.iota {dimensions = array<i32: 1>} : vector<8x8xi32>
    %cst_6 = arith.constant dense<0xFF800000> : vector<8xf32>
    %8 = vector.multi_reduction <maximumf>, %6, %cst_6 [1] : vector<8x8xf32> to vector<8xf32>
    %9 = vector.shape_cast %8 : vector<8xf32> to vector<8x1xf32>
    %10 = vector.broadcast %9 : vector<8x1xf32> to vector<8x8xf32>
    %11 = arith.cmpf oge, %6, %10 : vector<8x8xf32>
    %c8_i32 = arith.constant 8 : i32
    %12 = vector.broadcast %c8_i32 : i32 to vector<8x8xi32>
    %13 = arith.select %11, %7, %12 : vector<8x8xi1>, vector<8x8xi32>
    %cst_7 = arith.constant dense<2147483647> : vector<8xi32>
    %14 = vector.multi_reduction <minsi>, %13, %cst_7 [1] : vector<8x8xi32> to vector<8xi32>
    %15 = vector.shape_cast %14 : vector<8xi32> to vector<8x1xi32>
    %c0_8 = arith.constant 0 : index
    %c0_9 = arith.constant 0 : index
    %c0_10 = arith.constant 0 : index
    %16 = vector.load %arg6[%c0_8, %c0_9, %c0_10] : memref<1x8x1xi32, #tpu.memory_space<vmem>>, vector<1x8x1xi32>
    %17 = vector.shape_cast %16 : vector<1x8x1xi32> to vector<8x1xi32>
    %18 = vector.shape_cast %15 : vector<8x1xi32> to vector<1x8x1xi32>
    tpu.vector_store %arg6[%c0_8, %c0_9, %c0_10], %18 {strides = array<i32>} : memref<1x8x1xi32, #tpu.memory_space<vmem>>, vector<1x8x1xi32>,
    %cst_11 = arith.constant 5.000000e-02 : f32
    %19 = vector.broadcast %cst_11 : f32 to vector<8x32xf32>
    %20 = arith.mulf %1, %19 : vector<8x32xf32>
    %21 = tpu.iota {dimensions = array<i32: 0>} : vector<8x1xi32>
    %22 = arith.index_cast %arg0 : i32 to index
    %c0_12 = arith.constant 0 : index
    %23 = memref.load %arg1[%22, %c0_12] : memref<4x8xi32, #tpu.memory_space<smem>>
    %cst_13 = arith.constant 0.949999988 : f32
    %24 = vector.broadcast %cst_13 : f32 to vector<8x32xf32>
    %25 = arith.mulf %3, %24 : vector<8x32xf32>
    %26 = vector.extract_strided_slice %20 {offsets = [0, 0], sizes = [1, 32], strides = [1, 1]} : vector<8x32xf32> to vector<1x32xf32>
    %27 = vector.broadcast %26 : vector<1x32xf32> to vector<8x32xf32>
    %28 = arith.addf %25, %27 : vector<8x32xf32>
    %29 = arith.mulf %28, %28 : vector<8x32xf32>
    %cst_14 = arith.constant dense<0.000000e+00> : vector<8xf32>
    %30 = vector.multi_reduction <add>, %29, %cst_14 [1] : vector<8x32xf32> to vector<8xf32>
    %31 = vector.shape_cast %30 : vector<8xf32> to vector<8x1xf32>
    %cst_15 = arith.constant 1.000000e-24 : f32
    %32 = vector.broadcast %cst_15 : f32 to vector<8x1xf32>
    %33 = arith.maximumf %31, %32 : vector<8x1xf32>
    %34 = math.rsqrt %33 : vector<8x1xf32>
    %35 = vector.broadcast %34 : vector<8x1xf32> to vector<8x32xf32>
    %36 = arith.mulf %28, %35 : vector<8x32xf32>
    %37 = vector.broadcast %23 : i32 to vector<8x1xi32>
    %38 = arith.cmpi eq, %21, %37 : vector<8x1xi32>
    %39 = vector.shape_cast %38 : vector<8x1xi1> to vector<8x1xi1>
    %40 = vector.broadcast %39 : vector<8x1xi1> to vector<8x32xi1>
    %41 = arith.select %40, %36, %3 : vector<8x32xi1>, vector<8x32xf32>
    %42 = arith.index_cast %arg0 : i32 to index
    %c1 = arith.constant 1 : index
    %43 = memref.load %arg1[%42, %c1] : memref<4x8xi32, #tpu.memory_space<smem>>
    %cst_16 = arith.constant 0.949999988 : f32
    %44 = vector.broadcast %cst_16 : f32 to vector<8x32xf32>
    %45 = arith.mulf %41, %44 : vector<8x32xf32>
    %46 = vector.extract_strided_slice %20 {offsets = [1, 0], sizes = [1, 32], strides = [1, 1]} : vector<8x32xf32> to vector<1x32xf32>
    %47 = vector.broadcast %46 : vector<1x32xf32> to vector<8x32xf32>
    %48 = arith.addf %45, %47 : vector<8x32xf32>
    %49 = arith.mulf %48, %48 : vector<8x32xf32>
    %cst_17 = arith.constant dense<0.000000e+00> : vector<8xf32>
    %50 = vector.multi_reduction <add>, %49, %cst_17 [1] : vector<8x32xf32> to vector<8xf32>
    %51 = vector.shape_cast %50 : vector<8xf32> to vector<8x1xf32>
    %cst_18 = arith.constant 1.000000e-24 : f32
    %52 = vector.broadcast %cst_18 : f32 to vector<8x1xf32>
    %53 = arith.maximumf %51, %52 : vector<8x1xf32>
    %54 = math.rsqrt %53 : vector<8x1xf32>
    %55 = vector.broadcast %54 : vector<8x1xf32> to vector<8x32xf32>
    %56 = arith.mulf %48, %55 : vector<8x32xf32>
    %57 = vector.broadcast %43 : i32 to vector<8x1xi32>
    %58 = arith.cmpi eq, %21, %57 : vector<8x1xi32>
    %59 = vector.shape_cast %58 : vector<8x1xi1> to vector<8x1xi1>
    %60 = vector.broadcast %59 : vector<8x1xi1> to vector<8x32xi1>
    %61 = arith.select %60, %56, %41 : vector<8x32xi1>, vector<8x32xf32>
    %62 = arith.index_cast %arg0 : i32 to index
    %c2 = arith.constant 2 : index
    %63 = memref.load %arg1[%62, %c2] : memref<4x8xi32, #tpu.memory_space<smem>>
    %cst_19 = arith.constant 0.949999988 : f32
    %64 = vector.broadcast %cst_19 : f32 to vector<8x32xf32>
    %65 = arith.mulf %61, %64 : vector<8x32xf32>
    %66 = vector.extract_strided_slice %20 {offsets = [2, 0], sizes = [1, 32], strides = [1, 1]} : vector<8x32xf32> to vector<1x32xf32>
    %67 = vector.broadcast %66 : vector<1x32xf32> to vector<8x32xf32>
    %68 = arith.addf %65, %67 : vector<8x32xf32>
    %69 = arith.mulf %68, %68 : vector<8x32xf32>
    %cst_20 = arith.constant dense<0.000000e+00> : vector<8xf32>
    %70 = vector.multi_reduction <add>, %69, %cst_20 [1] : vector<8x32xf32> to vector<8xf32>
    %71 = vector.shape_cast %70 : vector<8xf32> to vector<8x1xf32>
    %cst_21 = arith.constant 1.000000e-24 : f32
    %72 = vector.broadcast %cst_21 : f32 to vector<8x1xf32>
    %73 = arith.maximumf %71, %72 : vector<8x1xf32>
    %74 = math.rsqrt %73 : vector<8x1xf32>
    %75 = vector.broadcast %74 : vector<8x1xf32> to vector<8x32xf32>
    %76 = arith.mulf %68, %75 : vector<8x32xf32>
    %77 = vector.broadcast %63 : i32 to vector<8x1xi32>
    %78 = arith.cmpi eq, %21, %77 : vector<8x1xi32>
    %79 = vector.shape_cast %78 : vector<8x1xi1> to vector<8x1xi1>
    %80 = vector.broadcast %79 : vector<8x1xi1> to vector<8x32xi1>
    %81 = arith.select %80, %76, %61 : vector<8x32xi1>, vector<8x32xf32>
    %82 = arith.index_cast %arg0 : i32 to index
    %c3 = arith.constant 3 : index
    %83 = memref.load %arg1[%82, %c3] : memref<4x8xi32, #tpu.memory_space<smem>>
    %cst_22 = arith.constant 0.949999988 : f32
    %84 = vector.broadcast %cst_22 : f32 to vector<8x32xf32>
    %85 = arith.mulf %81, %84 : vector<8x32xf32>
    %86 = vector.extract_strided_slice %20 {offsets = [3, 0], sizes = [1, 32], strides = [1, 1]} : vector<8x32xf32> to vector<1x32xf32>
    %87 = vector.broadcast %86 : vector<1x32xf32> to vector<8x32xf32>
    %88 = arith.addf %85, %87 : vector<8x32xf32>
    %89 = arith.mulf %88, %88 : vector<8x32xf32>
    %cst_23 = arith.constant dense<0.000000e+00> : vector<8xf32>
    %90 = vector.multi_reduction <add>, %89, %cst_23 [1] : vector<8x32xf32> to vector<8xf32>
    %91 = vector.shape_cast %90 : vector<8xf32> to vector<8x1xf32>
    %cst_24 = arith.constant 1.000000e-24 : f32
    %92 = vector.broadcast %cst_24 : f32 to vector<8x1xf32>
    %93 = arith.maximumf %91, %92 : vector<8x1xf32>
    %94 = math.rsqrt %93 : vector<8x1xf32>
    %95 = vector.broadcast %94 : vector<8x1xf32> to vector<8x32xf32>
    %96 = arith.mulf %88, %95 : vector<8x32xf32>
    %97 = vector.broadcast %83 : i32 to vector<8x1xi32>
    %98 = arith.cmpi eq, %21, %97 : vector<8x1xi32>
    %99 = vector.shape_cast %98 : vector<8x1xi1> to vector<8x1xi1>
    %100 = vector.broadcast %99 : vector<8x1xi1> to vector<8x32xi1>
    %101 = arith.select %100, %96, %81 : vector<8x32xi1>, vector<8x32xf32>
    %102 = arith.index_cast %arg0 : i32 to index
    %c4 = arith.constant 4 : index
    %103 = memref.load %arg1[%102, %c4] : memref<4x8xi32, #tpu.memory_space<smem>>
    %cst_25 = arith.constant 0.949999988 : f32
    %104 = vector.broadcast %cst_25 : f32 to vector<8x32xf32>
    %105 = arith.mulf %101, %104 : vector<8x32xf32>
    %106 = vector.extract_strided_slice %20 {offsets = [4, 0], sizes = [1, 32], strides = [1, 1]} : vector<8x32xf32> to vector<1x32xf32>
    %107 = vector.broadcast %106 : vector<1x32xf32> to vector<8x32xf32>
    %108 = arith.addf %105, %107 : vector<8x32xf32>
    %109 = arith.mulf %108, %108 : vector<8x32xf32>
    %cst_26 = arith.constant dense<0.000000e+00> : vector<8xf32>
    %110 = vector.multi_reduction <add>, %109, %cst_26 [1] : vector<8x32xf32> to vector<8xf32>
    %111 = vector.shape_cast %110 : vector<8xf32> to vector<8x1xf32>
    %cst_27 = arith.constant 1.000000e-24 : f32
    %112 = vector.broadcast %cst_27 : f32 to vector<8x1xf32>
    %113 = arith.maximumf %111, %112 : vector<8x1xf32>
    %114 = math.rsqrt %113 : vector<8x1xf32>
    %115 = vector.broadcast %114 : vector<8x1xf32> to vector<8x32xf32>
    %116 = arith.mulf %108, %115 : vector<8x32xf32>
    %117 = vector.broadcast %103 : i32 to vector<8x1xi32>
    %118 = arith.cmpi eq, %21, %117 : vector<8x1xi32>
    %119 = vector.shape_cast %118 : vector<8x1xi1> to vector<8x1xi1>
    %120 = vector.broadcast %119 : vector<8x1xi1> to vector<8x32xi1>
    %121 = arith.select %120, %116, %101 : vector<8x32xi1>, vector<8x32xf32>
    %122 = arith.index_cast %arg0 : i32 to index
    %c5 = arith.constant 5 : index
    %123 = memref.load %arg1[%122, %c5] : memref<4x8xi32, #tpu.memory_space<smem>>
    %cst_28 = arith.constant 0.949999988 : f32
    %124 = vector.broadcast %cst_28 : f32 to vector<8x32xf32>
    %125 = arith.mulf %121, %124 : vector<8x32xf32>
    %126 = vector.extract_strided_slice %20 {offsets = [5, 0], sizes = [1, 32], strides = [1, 1]} : vector<8x32xf32> to vector<1x32xf32>
    %127 = vector.broadcast %126 : vector<1x32xf32> to vector<8x32xf32>
    %128 = arith.addf %125, %127 : vector<8x32xf32>
    %129 = arith.mulf %128, %128 : vector<8x32xf32>
    %cst_29 = arith.constant dense<0.000000e+00> : vector<8xf32>
    %130 = vector.multi_reduction <add>, %129, %cst_29 [1] : vector<8x32xf32> to vector<8xf32>
    %131 = vector.shape_cast %130 : vector<8xf32> to vector<8x1xf32>
    %cst_30 = arith.constant 1.000000e-24 : f32
    %132 = vector.broadcast %cst_30 : f32 to vector<8x1xf32>
    %133 = arith.maximumf %131, %132 : vector<8x1xf32>
    %134 = math.rsqrt %133 : vector<8x1xf32>
    %135 = vector.broadcast %134 : vector<8x1xf32> to vector<8x32xf32>
    %136 = arith.mulf %128, %135 : vector<8x32xf32>
    %137 = vector.broadcast %123 : i32 to vector<8x1xi32>
    %138 = arith.cmpi eq, %21, %137 : vector<8x1xi32>
    %139 = vector.shape_cast %138 : vector<8x1xi1> to vector<8x1xi1>
    %140 = vector.broadcast %139 : vector<8x1xi1> to vector<8x32xi1>
    %141 = arith.select %140, %136, %121 : vector<8x32xi1>, vector<8x32xf32>
    %142 = arith.index_cast %arg0 : i32 to index
    %c6 = arith.constant 6 : index
    %143 = memref.load %arg1[%142, %c6] : memref<4x8xi32, #tpu.memory_space<smem>>
    %cst_31 = arith.constant 0.949999988 : f32
    %144 = vector.broadcast %cst_31 : f32 to vector<8x32xf32>
    %145 = arith.mulf %141, %144 : vector<8x32xf32>
    %146 = vector.extract_strided_slice %20 {offsets = [6, 0], sizes = [1, 32], strides = [1, 1]} : vector<8x32xf32> to vector<1x32xf32>
    %147 = vector.broadcast %146 : vector<1x32xf32> to vector<8x32xf32>
    %148 = arith.addf %145, %147 : vector<8x32xf32>
    %149 = arith.mulf %148, %148 : vector<8x32xf32>
    %cst_32 = arith.constant dense<0.000000e+00> : vector<8xf32>
    %150 = vector.multi_reduction <add>, %149, %cst_32 [1] : vector<8x32xf32> to vector<8xf32>
    %151 = vector.shape_cast %150 : vector<8xf32> to vector<8x1xf32>
    %cst_33 = arith.constant 1.000000e-24 : f32
    %152 = vector.broadcast %cst_33 : f32 to vector<8x1xf32>
    %153 = arith.maximumf %151, %152 : vector<8x1xf32>
    %154 = math.rsqrt %153 : vector<8x1xf32>
    %155 = vector.broadcast %154 : vector<8x1xf32> to vector<8x32xf32>
    %156 = arith.mulf %148, %155 : vector<8x32xf32>
    %157 = vector.broadcast %143 : i32 to vector<8x1xi32>
    %158 = arith.cmpi eq, %21, %157 : vector<8x1xi32>
    %159 = vector.shape_cast %158 : vector<8x1xi1> to vector<8x1xi1>
    %160 = vector.broadcast %159 : vector<8x1xi1> to vector<8x32xi1>
    %161 = arith.select %160, %156, %141 : vector<8x32xi1>, vector<8x32xf32>
    %162 = arith.index_cast %arg0 : i32 to index
    %c7 = arith.constant 7 : index
    %163 = memref.load %arg1[%162, %c7] : memref<4x8xi32, #tpu.memory_space<smem>>
    %cst_34 = arith.constant 0.949999988 : f32
    %164 = vector.broadcast %cst_34 : f32 to vector<8x32xf32>
    %165 = arith.mulf %161, %164 : vector<8x32xf32>
    %166 = vector.extract_strided_slice %20 {offsets = [7, 0], sizes = [1, 32], strides = [1, 1]} : vector<8x32xf32> to vector<1x32xf32>
    %167 = vector.broadcast %166 : vector<1x32xf32> to vector<8x32xf32>
    %168 = arith.addf %165, %167 : vector<8x32xf32>
    %169 = arith.mulf %168, %168 : vector<8x32xf32>
    %cst_35 = arith.constant dense<0.000000e+00> : vector<8xf32>
    %170 = vector.multi_reduction <add>, %169, %cst_35 [1] : vector<8x32xf32> to vector<8xf32>
    %171 = vector.shape_cast %170 : vector<8xf32> to vector<8x1xf32>
    %cst_36 = arith.constant 1.000000e-24 : f32
    %172 = vector.broadcast %cst_36 : f32 to vector<8x1xf32>
    %173 = arith.maximumf %171, %172 : vector<8x1xf32>
    %174 = math.rsqrt %173 : vector<8x1xf32>
    %175 = vector.broadcast %174 : vector<8x1xf32> to vector<8x32xf32>
    %176 = arith.mulf %168, %175 : vector<8x32xf32>
    %177 = vector.broadcast %163 : i32 to vector<8x1xi32>
    %178 = arith.cmpi eq, %21, %177 : vector<8x1xi32>
    %179 = vector.shape_cast %178 : vector<8x1xi1> to vector<8x1xi1>
    %180 = vector.broadcast %179 : vector<8x1xi1> to vector<8x32xi1>
    %181 = arith.select %180, %176, %161 : vector<8x32xi1>, vector<8x32xf32>
    %c0_37 = arith.constant 0 : index
    %c0_38 = arith.constant 0 : index
    %c0_39 = arith.constant 0 : index
    %182 = vector.load %arg7[%c0_37, %c0_38, %c0_39] : memref<1x8x32xf32, #tpu.memory_space<vmem>>, vector<1x8x32xf32>
    %183 = vector.shape_cast %182 : vector<1x8x32xf32> to vector<8x32xf32>
    %184 = vector.shape_cast %181 : vector<8x32xf32> to vector<1x8x32xf32>
    tpu.vector_store %arg7[%c0_37, %c0_38, %c0_39], %184 {strides = array<i32>} : memref<1x8x32xf32, #tpu.memory_space<vmem>>, vector<1x8x32xf32>,
    %cst_40 = arith.constant dense<0.000000e+00> : vector<8x8xf32>
    %185 = tpu.matmul %181, %181, %cst_40 {dimension_numbers = #tpu.dot_dimension_numbers<[1], [1], [0], [0], [0, 0, 1, 0], [], []>} : vector<8x32xf32>, vector<8x32xf32>, vector<8x8xf32> -> vector<8x8xf32>
    %cst_41 = arith.constant 1.000000e+01 : f32
    %186 = vector.broadcast %cst_41 : f32 to vector<8x8xf32>
    %187 = arith.mulf %185, %186 : vector<8x8xf32>
    %188 = tpu.iota {dimensions = array<i32: 0>} : vector<8x8xi32>
    %189 = tpu.iota {dimensions = array<i32: 1>} : vector<8x8xi32>
    %190 = arith.cmpi eq, %188, %189 : vector<8x8xi32>
    %191 = math.exp %187 : vector<8x8xf32>
    %cst_42 = arith.constant 0.000000e+00 : f32
    %192 = vector.broadcast %cst_42 : f32 to vector<8x8xf32>
    %193 = arith.select %190, %192, %191 : vector<8x8xi1>, vector<8x8xf32>
    %cst_43 = arith.constant dense<0.000000e+00> : vector<8xf32>
    %194 = vector.multi_reduction <add>, %193, %cst_43 [1] : vector<8x8xf32> to vector<8xf32>
    %195 = vector.shape_cast %194 : vector<8xf32> to vector<8x1xf32>
    %196 = math.log %195 : vector<8x1xf32>
    %cst_44 = arith.constant 1.9459101 : f32
    %197 = vector.broadcast %cst_44 : f32 to vector<8x1xf32>
    %198 = arith.subf %196, %197 : vector<8x1xf32>
    %199 = vector.shape_cast %198 : vector<8x1xf32> to vector<1x8x1xf32>
    %cst_45 = arith.constant dense<0.000000e+00> : vector<1xf32>
    %200 = vector.multi_reduction <add>, %199, %cst_45 [1, 2] : vector<1x8x1xf32> to vector<1xf32>
    %201 = vector.shape_cast %200 : vector<1xf32> to vector<1x1x1xf32>
    %202 = vector.extract %201[0, 0, 0] : f32 from vector<1x1x1xf32>
    %cst_46 = arith.constant 8.000000e+00 : f32
    %203 = arith.divf %202, %cst_46 : f32
    %cst_47 = arith.constant 1.000000e+00 : f32
    %204 = arith.mulf %cst_47, %203 : f32
    %c0_48 = arith.constant 0 : index
    %c0_49 = arith.constant 0 : index
    %c0_50 = arith.constant 0 : index
    %205 = vector.load %arg4[%c0_48, %c0_49, %c0_50] : memref<1x8x2xi32, #tpu.memory_space<vmem>>, vector<1x8x1xi32>
    %206 = vector.shape_cast %205 : vector<1x8x1xi32> to vector<8x1xi32>
    %207 = vector.broadcast %206 : vector<8x1xi32> to vector<8x8xi32>
    %208 = arith.cmpi eq, %207, %7 : vector<8x8xi32>
    %209 = arith.extui %208 : vector<8x8xi1> to vector<8x8xi32>
    %210 = arith.sitofp %209 : vector<8x8xi32> to vector<8x8xf32>
    %211 = arith.mulf %181, %181 : vector<8x32xf32>
    %cst_51 = arith.constant dense<0.000000e+00> : vector<8xf32>
    %212 = vector.multi_reduction <add>, %211, %cst_51 [1] : vector<8x32xf32> to vector<8xf32>
    %213 = vector.shape_cast %212 : vector<8xf32> to vector<8x1xf32>
    %cst_52 = arith.constant 1.000000e-24 : f32
    %214 = vector.broadcast %cst_52 : f32 to vector<8x1xf32>
    %215 = arith.maximumf %213, %214 : vector<8x1xf32>
    %216 = math.rsqrt %215 : vector<8x1xf32>
    %217 = vector.broadcast %216 : vector<8x1xf32> to vector<8x32xf32>
    %218 = arith.mulf %181, %217 : vector<8x32xf32>
    %cst_53 = arith.constant dense<0.000000e+00> : vector<8x8xf32>
    %219 = tpu.matmul %1, %218, %cst_53 {dimension_numbers = #tpu.dot_dimension_numbers<[1], [1], [0], [0], [0, 0, 1, 0], [], []>} : vector<8x32xf32>, vector<8x32xf32>, vector<8x8xf32> -> vector<8x8xf32>
    %cst_54 = arith.constant 1.000000e+01 : f32
    %220 = vector.broadcast %cst_54 : f32 to vector<8x8xf32>
    %221 = arith.mulf %219, %220 : vector<8x8xf32>
    %c0_55 = arith.constant 0 : index
    %c0_56 = arith.constant 0 : index
    %c1_57 = arith.constant 1 : index
    %222 = vector.load %arg4[%c0_55, %c0_56, %c1_57] : memref<1x8x2xi32, #tpu.memory_space<vmem>>, vector<1x8x1xi32>
    %223 = vector.shape_cast %222 : vector<1x8x1xi32> to vector<8x1xi32>
    %cst_58 = arith.constant dense<0.000000e+00> : vector<8x8xf32>
    %224 = tpu.matmul %1, %1, %cst_58 {dimension_numbers = #tpu.dot_dimension_numbers<[1], [1], [0], [0], [0, 0, 1, 0], [], []>} : vector<8x32xf32>, vector<8x32xf32>, vector<8x8xf32> -> vector<8x8xf32>
    %cst_59 = arith.constant 1.000000e+01 : f32
    %225 = vector.broadcast %cst_59 : f32 to vector<8x8xf32>
    %226 = arith.mulf %224, %225 : vector<8x8xf32>
    %cst_60 = arith.constant dense<0.000000e+00> : vector<8x8xf32>
    %227 = tpu.matmul %210, %210, %cst_60 {dimension_numbers = #tpu.dot_dimension_numbers<[1], [1], [0], [0], [0, 0, 1, 0], [], []>} : vector<8x8xf32>, vector<8x8xf32>, vector<8x8xf32> -> vector<8x8xf32>
    %228 = tpu.iota {dimensions = array<i32: 1>} : vector<8x8xi32>
    %229 = vector.broadcast %223 : vector<8x1xi32> to vector<8x8xi32>
    %230 = arith.cmpi eq, %229, %228 : vector<8x8xi32>
    %231 = arith.extui %230 : vector<8x8xi1> to vector<8x8xi32>
    %232 = arith.sitofp %231 : vector<8x8xi32> to vector<8x8xf32>
    %cst_61 = arith.constant dense<0.000000e+00> : vector<8x8xf32>
    %233 = tpu.matmul %232, %232, %cst_61 {dimension_numbers = #tpu.dot_dimension_numbers<[1], [1], [0], [0], [0, 0, 1, 0], [], []>} : vector<8x8xf32>, vector<8x8xf32>, vector<8x8xf32> -> vector<8x8xf32>
    %cst_62 = arith.constant 1.000000e+00 : f32
    %234 = vector.broadcast %cst_62 : f32 to vector<8x8xf32>
    %235 = arith.subf %234, %227 : vector<8x8xf32>
    %236 = arith.mulf %235, %233 : vector<8x8xf32>
    %cst_63 = arith.constant dense<0xFF800000> : vector<8xf32>
    %237 = vector.multi_reduction <maximumf>, %226, %cst_63 [1] : vector<8x8xf32> to vector<8xf32>
    %238 = vector.shape_cast %237 : vector<8xf32> to vector<8x1xf32>
    %239 = vector.broadcast %238 : vector<8x1xf32> to vector<8x8xf32>
    %240 = arith.subf %221, %239 : vector<8x8xf32>
    %241 = vector.broadcast %238 : vector<8x1xf32> to vector<8x8xf32>
    %242 = arith.subf %226, %241 : vector<8x8xf32>
    %243 = arith.mulf %240, %210 : vector<8x8xf32>
    %cst_64 = arith.constant dense<0.000000e+00> : vector<8xf32>
    %244 = vector.multi_reduction <add>, %243, %cst_64 [1] : vector<8x8xf32> to vector<8xf32>
    %245 = vector.shape_cast %244 : vector<8xf32> to vector<8x1xf32>
    %246 = math.exp %240 : vector<8x8xf32>
    %cst_65 = arith.constant dense<0.000000e+00> : vector<8xf32>
    %247 = vector.multi_reduction <add>, %246, %cst_65 [1] : vector<8x8xf32> to vector<8xf32>
    %248 = vector.shape_cast %247 : vector<8xf32> to vector<8x1xf32>
    %249 = math.exp %242 : vector<8x8xf32>
    %250 = arith.mulf %236, %249 : vector<8x8xf32>
    %cst_66 = arith.constant dense<0.000000e+00> : vector<8xf32>
    %251 = vector.multi_reduction <add>, %250, %cst_66 [1] : vector<8x8xf32> to vector<8xf32>
    %252 = vector.shape_cast %251 : vector<8xf32> to vector<8x1xf32>
    %253 = arith.addf %248, %252 : vector<8x1xf32>
    %cst_67 = arith.constant 9.99999993E-9 : f32
    %254 = vector.broadcast %cst_67 : f32 to vector<8x1xf32>
    %255 = arith.addf %253, %254 : vector<8x1xf32>
    %256 = math.log %255 : vector<8x1xf32>
    %257 = arith.subf %245, %256 : vector<8x1xf32>
    %258 = vector.shape_cast %257 : vector<8x1xf32> to vector<1x8x1xf32>
    %cst_68 = arith.constant dense<0.000000e+00> : vector<1xf32>
    %259 = vector.multi_reduction <add>, %258, %cst_68 [1, 2] : vector<1x8x1xf32> to vector<1xf32>
    %260 = vector.shape_cast %259 : vector<1xf32> to vector<1x1x1xf32>
    %261 = vector.extract %260[0, 0, 0] : f32 from vector<1x1x1xf32>
    %cst_69 = arith.constant 8.000000e+00 : f32
    %262 = arith.divf %261, %cst_69 : f32
    %cst_70 = arith.constant -1.000000e+00 : f32
    %263 = arith.mulf %cst_70, %262 : f32
    %cst_71 = arith.constant 2.000000e+00 : f32
    %264 = arith.mulf %cst_71, %263 : f32
    %265 = arith.addf %204, %264 : f32
    %266 = tpu.iota {dimensions = array<i32: 1>} : vector<1x3xi32>
    %c0_i32 = arith.constant 0 : i32
    %267 = vector.broadcast %c0_i32 : i32 to vector<1x3xi32>
    %268 = arith.cmpi eq, %266, %267 : vector<1x3xi32>
    %cst_72 = arith.constant 0.000000e+00 : f32
    %269 = vector.broadcast %265 : f32 to vector<1x3xf32>
    %270 = vector.broadcast %cst_72 : f32 to vector<1x3xf32>
    %271 = arith.select %268, %269, %270 : vector<1x3xi1>, vector<1x3xf32>
    %c1_i32 = arith.constant 1 : i32
    %272 = vector.broadcast %c1_i32 : i32 to vector<1x3xi32>
    %273 = arith.cmpi eq, %266, %272 : vector<1x3xi32>
    %cst_73 = arith.constant 0.000000e+00 : f32
    %274 = vector.broadcast %204 : f32 to vector<1x3xf32>
    %275 = vector.broadcast %cst_73 : f32 to vector<1x3xf32>
    %276 = arith.select %273, %274, %275 : vector<1x3xi1>, vector<1x3xf32>
    %277 = arith.addf %271, %276 : vector<1x3xf32>
    %c2_i32 = arith.constant 2 : i32
    %278 = vector.broadcast %c2_i32 : i32 to vector<1x3xi32>
    %279 = arith.cmpi eq, %266, %278 : vector<1x3xi32>
    %cst_74 = arith.constant 0.000000e+00 : f32
    %280 = vector.broadcast %263 : f32 to vector<1x3xf32>
    %281 = vector.broadcast %cst_74 : f32 to vector<1x3xf32>
    %282 = arith.select %279, %280, %281 : vector<1x3xi1>, vector<1x3xf32>
    %283 = arith.addf %277, %282 : vector<1x3xf32>
    %c0_75 = arith.constant 0 : index
    %c0_76 = arith.constant 0 : index
    %c0_77 = arith.constant 0 : index
    %284 = vector.load %arg5[%c0_75, %c0_76, %c0_77] : memref<1x1x3xf32, #tpu.memory_space<vmem>>, vector<1x1x3xf32>
    %285 = vector.shape_cast %284 : vector<1x1x3xf32> to vector<1x3xf32>
    %286 = vector.shape_cast %283 : vector<1x3xf32> to vector<1x1x3xf32>
    tpu.vector_store %arg5[%c0_75, %c0_76, %c0_77], %286 {strides = array<i32>} : memref<1x1x3xf32, #tpu.memory_space<vmem>>, vector<1x1x3xf32>,
    return
  }
  func.func @transform_0(%arg0: i32, %arg1: memref<4x8xi32, #tpu.memory_space<smem>>) -> (i32, i32, i32) {
    %c0_i32 = arith.constant 0 : i32
    %c0_i32_0 = arith.constant 0 : i32
    %c0_i32_1 = arith.constant 0 : i32
    return %arg0, %c0_i32, %c0_i32_0 : i32, i32, i32
  }
  func.func @transform_1(%arg0: i32, %arg1: memref<4x8xi32, #tpu.memory_space<smem>>) -> (i32, i32, i32) {
    %c0_i32 = arith.constant 0 : i32
    %c0_i32_0 = arith.constant 0 : i32
    %c0_i32_1 = arith.constant 0 : i32
    return %arg0, %c0_i32, %c0_i32_0 : i32, i32, i32
  }
  func.func @transform_2(%arg0: i32, %arg1: memref<4x8xi32, #tpu.memory_space<smem>>) -> (i32, i32, i32) {
    %c0_i32 = arith.constant 0 : i32
    %c0_i32_0 = arith.constant 0 : i32
    %c0_i32_1 = arith.constant 0 : i32
    return %arg0, %c0_i32, %c0_i32_0 : i32, i32, i32
  }
  func.func @transform_3(%arg0: i32, %arg1: memref<4x8xi32, #tpu.memory_space<smem>>) -> (i32, i32, i32) {
    %c0_i32 = arith.constant 0 : i32
    %c0_i32_0 = arith.constant 0 : i32
    %c0_i32_1 = arith.constant 0 : i32
    return %arg0, %c0_i32, %c0_i32_0 : i32, i32, i32
  }
  func.func @transform_4(%arg0: i32, %arg1: memref<4x8xi32, #tpu.memory_space<smem>>) -> (i32, i32, i32) {
    %c0_i32 = arith.constant 0 : i32
    %c0_i32_0 = arith.constant 0 : i32
    %c0_i32_1 = arith.constant 0 : i32
    return %arg0, %c0_i32, %c0_i32_0 : i32, i32, i32
  }
  func.func @transform_5(%arg0: i32, %arg1: memref<4x8xi32, #tpu.memory_space<smem>>) -> (i32, i32, i32) {
    %c0_i32 = arith.constant 0 : i32
    %c0_i32_0 = arith.constant 0 : i32
    %c0_i32_1 = arith.constant 0 : i32
    return %arg0, %c0_i32, %c0_i32_0 : i32, i32, i32
  }
}

</mosaic_0001>

<bundles_post_ra>
// kernel: tpu_custom_call.1
= control target key start
LH: loop header
LB: loop body
LE: loop exit
PB: predicated region body
PF: predicated region fallthrough
CT: control target
= control target key end

     0   :  { %s1205_s24 = smov [#allocation3]   ;;  %s1491_s0 = inlined_call_operand.vmem [shape: s32[4,8], index: 0, kind: input, shape index: {}]   ;;  %s1492_s1 = inlined_call_operand.vmem [shape: f32[4,8,32], index: 1, kind: input, shape index: {}]   ;;  %s1493_s2 = inlined_call_operand.hbm [shape: f32[4,8,32], index: 2, kind: input, shape index: {}]   ;;  %s1494_s3 = inlined_call_operand.vmem [shape: s32[4,8,2], index: 3, kind: input, shape index: {}]   ;;  %s1495_s4 = inlined_call_operand.vmem [shape: f32[4,1,3], index: 4, kind: output, shape index: {0}]   ;;  %s1496_s5 = inlined_call_operand.vmem [shape: s32[4,8,1], index: 5, kind: output, shape index: {1}]   ;;  %s1497_s6 = inlined_call_operand.hbm [shape: f32[4,8,32], index: 6, kind: output, shape index: {2}]  }
   0x1   :  { %s13_s23 = sshll.u32 %s1491_s0, 4  ;;  %s14_s23 = int_to_ptr.vmem [resolvable:$true] %s13_s23 }
   0x2   :  { %16 = dma.vmem_to_smem %s14_s23, 64, %s1205_s24, [#allocation2] }
   0x3   :  { %1179 = dma.done.wait [#allocation2], 64 }
   0x4   :  { %1180 = vsyncadd [#allocation2], 4294967232 }
   0x5   :  { %19 = sfence }
   0x6   :  { %20 = vsyncpa [#allocation5], 0 }
   0x7   :  { %22 = vsyncpa [#allocation5 + $0x1], 0 }
   0x8   :  { %23 = vsyncpa [#allocation6], 0 }
   0x9   :  { %25 = vsyncpa [#allocation6 + $0x1], 0  ;;  %s1248_s25 = smov 0   ;;  %s1250_s26 = smov 0  }
   0xa   :  { %s1252_s27 = smov 0   ;;  %s1254_s28 = smov 0  }
   0xb LB: > { %s1269_s0 = sadd.s32 4294967295, %s1203_s28   ;;  %s972_s29 = sadd.s32 4294967294, %s1203_s28   ;;  %s1203_s28 = sphi %s1254_s28, %s1506_s28   ;;  %s1199_s27 = sphi %s1252_s27, %s1505_s27   ;;  %s1195_s26 = sphi %s1250_s26, %s1504_s26   ;;  %s1191_s25 = sphi %s1248_s25, %s1503_s25  }
   0xc   : > { %s1273_s30 = sadd.s32 1, %s1203_s28   ;;  %s64_s7 = sadd.s32 1, %s1199_s27 }
   0xd   : > { %s61_s8 = ssub.s32 %s1203_s28, %s1273_s30  ;;  %p71_p0 = scmp.ne.s32.totalorder %s1199_s27, %s1195_s26 }
   0xe   : > { %p62_p1 = scmp.eq.s32.totalorder %s61_s8, 0  ;;  %p72_p2 = scmp.eq.s32.totalorder %s1203_s28, 0 }
   0xf   : > { %p77_p3 = scmp.ne.s32.totalorder %s1195_s26, %s1191_s25  ;;  %p78_p4 = scmp.eq.s32.totalorder %s1269_s0, 0 }
  0x10   : > { %s1285_s9 = scalar_select %p62_p1, %s1199_s27, %s64_s7  }
  0x11   : > { %p1287_p5 = por %p72_p2, %p71_p0  ;;  %p1291_p6 = por %p78_p4, %p77_p3 }
  0x12   : > { %p179_p7 = scmp.eq.s32.totalorder %s1269_s0, 3  ;;  %p185_p8 = scmp.eq.s32.totalorder %s972_s29, 3 }
  0x13   : > { %p1021_p9 = scmp.lt.s32.totalorder %s1203_s28, 4  ;;  %s212_s14 = sand.u32 1, %s1199_s27  }
  0x14   : > { %p1297_p10 = por %p179_p7, %p71_p0  ;;  %p1301_p11 = por %p185_p8, %p77_p3 }
  0x15   : > { %s976_s15 = sshll.u32 %s1203_s28, 3  ;;  %s975_s16 = sshll.u32 %s212_s14, 3 }
  0x16   : > { %s220_s19 = scalar_lea.hbm %s1493_s2, %s976_s15  ;;  %s216_s21 = scalar_lea.vmem [#allocation4], %s975_s16 }
  0x17   : > { %s222_s20 = sshll.u32 %s220_s19, 4  ;;  %s224_s22 = sshll.u32 %s216_s21, 4  ;;  %s223_s20 = int_to_ptr.hbm [resolvable:$true] %s222_s20  ;;  %s225_s22 = int_to_ptr.vmem [resolvable:$true] %s224_s22 }
  0x18   : > { %p1312_p12 = pnand %p1021_p9, %p1287_p5  ;;  %p977_p13 = scmp.ge.s32.totalorder %s1203_s28, 1 }
  0x19   : > { %p236_p0 = scmp.lt.s32.totalorder %s1203_s28, 5  ;;  %s213_s24 = scalar_lea.sflag [#allocation5], %s212_s14 }
  0x1a   : > { %s1105_s29 = sshra.s32 %s223_s20, 4  ;;  %p1109_p2 = pneg %p1312_p12  ;;  %s1106_s29 = int_to_ptr.hbm [resolvable:$true] %s1105_s29 }
  0x1b   : > { %s1107_s7 = scalar_lea.hbm %s1106_s29, 8  ;;  %s1112_s10 = scalar_lea.hbm %s1493_s2, 32 }
  0x1c   : > { %p1108_p1 = scmp.ne.s32.totalorder %s1106_s29, %s1107_s7  ;;  %p1113_p5 = scmp.lt.s32.totalorder %s1106_s29, %s1493_s2 }
  0x1d   : > { %p1114_p7 = scmp.lt.s32.totalorder %s1112_s10, %s1107_s7 }
  0x1e   : > { %p1110_p3 = pnand %p1109_p2, %p1108_p1 }
  0x1f   : > { %p1115_p8 = por %p1114_p7, %p1113_p5 }
  0x20   : > { %p1111_p4 = pneg %p1110_p3 }
  0x22   : > { %p1116_p9 = pnand %p1115_p8, %p1111_p4 }
  0x24   : > { %1119 = shalt.err (!%p1116_p9)
}
  0x25   : > { %1016 = dma.hbm_to_vmem [thread:$0]  (!%p1312_p12), %s223_s20, 128, %s225_s22, %s213_s24  }
  0x26   : > { %p237_p1 = pnand %p977_p13, %p236_p0 }
  0x27   : > { %s1333_s14 = sand.u32 (!%p237_p1), 1, %s1195_s26  }
  0x28   : > { %240 = sbr.rel (%p237_p1) target bundleno = 1892 (0x764), region = 32  ;;  %s978_s18 = sshll.u32 (!%p237_p1), %s1333_s14, 3 }
  0x29   : > { %s243_s19 = scalar_lea.sflag (!%p237_p1), [#allocation5], %s1333_s14  ;;  %s246_s21 = scalar_lea.vmem (!%p237_p1), [#allocation4], %s978_s18 }
  0x2d   : > { %1182 = dma.done.wait (%p1291_p6), %s243_s19, 128  }
  0x2e   : > { %1184 = vsyncadd (%p1291_p6), %s243_s19, 4294967168  ;;  %p289_p12 = scmp.lt.s32.totalorder %s1269_s0, 3  ;;  %v305_v1 = vld [vmem:[%s246_s21] sm:$0xff]  ;;  %vm306_vm0 = vcmask 261120   ;;  %s1369_s11 = sshll.u32 %s1269_s0, 7  ;;  %v334_v13 = vlaneseq }
  0x2f   : > { %v364_v3 = vmul.f32 0.95, %v305_v1  ;;  %983 = vmatpush.xpose.msk.msra.mxu0 %vm306_vm0, %v305_v1  ;;  %s363_s7 = sld [smem:[#allocation3 + %s1369_s11]]  ;;  %s388_s8 = sadd.s32 1, %s1369_s11 }
  0x30   : > { %s1345_s20 = scalar_select %p289_p12, %s1269_s0, 3  ;;  %v1373_v16 = vshrl.u32 %v334_v13, 7 }
  0x31   : > { %s389_s15 = sld [smem:[#allocation3 + %s388_s8]]  ;;  %s414_s10 = sadd.s32 2, %s1369_s11 }
  0x32   : > { %s1348_s22 = sshll.u32 %s1345_s20, 3  ;;  %s415_s16 = sld [smem:[#allocation3 + %s414_s10]] }
  0x33   : > { %s292_s29 = scalar_lea.vmem %s1492_s1, %s1348_s22  ;;  %s440_s17 = sadd.s32 3, %s1369_s11 }
  0x34   : > { %v1354_v0 = vld [vmem:[%s292_s29] sm:$0xff]  ;;  %s441_s19 = sld [smem:[#allocation3 + %s440_s17]]  ;;  %s466_s21 = sadd.s32 4, %s1369_s11 }
  0x35   : > { %v1357_v2 = vmul.f32 0.05, %v1354_v0  ;;  %992 = vmatpush.xpose.msk.msra.mxu3 %vm306_vm0, %v1354_v0  ;;  %984 = vmatmul.msk.f32.vlgmr.msra.gmra.mxu0 %vm306_vm0, %v1354_v0  ;;  %v383_v17 = vstv %s363_s7  ;;  %s467_s23 = sld [smem:[#allocation3 + %s466_s21]]  ;;  %s492_s24 = sadd.s32 5, %s1369_s11 }
  0x36   : > { %vm384_vm4 = vcmp.eq.s32.totalorder %v1373_v16, %v383_v17  ;;  %s493_s29 = sld [smem:[#allocation3 + %s492_s24]]  ;;  %s518_s10 = sadd.s32 6, %s1369_s11 }
  0x37   : > { %v365_v4 = vperm.slane %v1357_v2, 0  ;;  %v391_v21 = vperm.slane %v1357_v2, 1  ;;  %v409_v34 = vstv %s389_s15  ;;  %v417_v38 = vperm.slane %v1357_v2, 2  ;;  %s296_s15 = scalar_lea.vmem %s1494_s3, %s1348_s22  ;;  %s544_s17 = sadd.s32 7, %s1369_s11 }
  0x38   : > { %993 = vmatmul.msk.f32.vlgmr.msra.gmra.mxu3 %vm306_vm0, %v1354_v0  ;;  %vm410_vm8 = vcmp.eq.s32.totalorder %v1373_v16, %v409_v34  ;;  %v435_v51 = vstv %s415_s16  ;;  %v443_v55 = vperm.slane %v1357_v2, 3  ;;  %s519_s16 = sld [smem:[#allocation3 + %s518_s10]]  ;;  %s1421_s11 = scalar_lea.vmem [#allocation7], %s978_s18 }
  0x39   : > { %v366_v5 = vadd.f32 %v365_v4, %v364_v3  ;;  %vm436_vm12 = vcmp.eq.s32.totalorder %v1373_v16, %v435_v51  ;;  %s1000_s18 = sshll.u32 %s1269_s0, 3  ;;  %s814_s8 = scalar_lea.sflag [#allocation6], %s1333_s14 }
  0x3a   : > { %s830_s24 = scalar_lea.hbm %s1497_s6, %s1000_s18 }
  0x3b   : > { %v367_v6 = vmul.f32 %v366_v5, %v366_v5  ;;  %s834_s7 = sshll.u32 %s830_s24, 4  ;;  %s835_s7 = int_to_ptr.hbm [resolvable:$true] %s834_s7 }
  0x3d   : > { %v368_v7 = vsel %vm306_vm0, %v367_v6, 0.0  ;;  %v461_v6 = vstv %s441_s19  ;;  %s545_s19 = sld [smem:[#allocation3 + %s544_s17]]  ;;  %s1155_s17 = scalar_lea.hbm %s1497_s6, 32 }
  0x3e   : > { %369 = vadd.xlane.f32.xlu0 %v368_v7 }
  0xb1   : > { %v370_v8 = vpop.xlane.xlu0 %369 }
  0xb2   : > { %v371_v9 = vmax.f32 %v370_v8, 1e-24 }
  0xb4   : > { %1063 = vrsqrt.f32 %v371_v9  ;;  %vm378_vm2 = vweird.f32 %v371_v9 }
  0xba   : > { %v1064_v10 = vpop.eup %1063 }
  0xbb   : > { %v373_v11 = vmul.f32 %v1064_v10, %v371_v9  ;;  %vm379_vm1 = vweird.f32 %v1064_v10 }
  0xbc   : > { %vm380_vm3 = vmor %vm378_vm2, %vm379_vm1  ;;  %vm462_vm1 = vcmp.eq.s32.totalorder %v1373_v16, %v461_v6 }
  0xbd   : > { %v374_v12 = vmul.f32 %v1064_v10, %v373_v11 }
  0xbf   : > { %v375_v14 = vmul.f32 0.5, %v374_v12 }
  0xc1   : > { %v376_v15 = vsub.f32 1.5, %v375_v14 }
  0xc3   : > { %v377_v18 = vmul.f32 %v1064_v10, %v376_v15 }
  0xc5   : > { %v381_v19 = vsel %vm380_vm3, %v1064_v10, %v377_v18  ;;  %v469_v10 = vperm.slane %v1357_v2, 4 }
  0xc6   : > { %v382_v20 = vmul.f32 %v381_v19, %v366_v5 }
  0xc8   : > { %v387_v22 = vsel %vm384_vm4, %v382_v20, %v305_v1 }
  0xc9   : > { %v390_v23 = vmul.f32 0.95, %v387_v22 }
  0xcb   : > { %v392_v24 = vadd.f32 %v391_v21, %v390_v23 }
  0xcd   : > { %v393_v25 = vmul.f32 %v392_v24, %v392_v24 }
  0xcf   : > { %v394_v26 = vsel %vm306_vm0, %v393_v25, 0.0  ;;  %v487_v25 = vstv %s467_s23 }
  0xd0   : > { %395 = vadd.xlane.f32.xlu0 %v394_v26 }
 0x143   : > { %v396_v27 = vpop.xlane.xlu0 %395 }
 0x144   : > { %v397_v28 = vmax.f32 %v396_v27, 1e-24 }
 0x146   : > { %1065 = vrsqrt.f32 %v397_v28  ;;  %vm404_vm6 = vweird.f32 %v397_v28 }
 0x14c   : > { %v1066_v29 = vpop.eup %1065 }
 0x14d   : > { %v399_v30 = vmul.f32 %v1066_v29, %v397_v28  ;;  %vm405_vm5 = vweird.f32 %v1066_v29 }
 0x14e   : > { %vm406_vm7 = vmor %vm404_vm6, %vm405_vm5  ;;  %vm488_vm5 = vcmp.eq.s32.totalorder %v1373_v16, %v487_v25 }
 0x14f   : > { %v400_v31 = vmul.f32 %v1066_v29, %v399_v30 }
 0x151   : > { %v401_v32 = vmul.f32 0.5, %v400_v31 }
 0x153   : > { %v402_v33 = vsub.f32 1.5, %v401_v32 }
 0x155   : > { %v403_v35 = vmul.f32 %v1066_v29, %v402_v33 }
 0x157   : > { %v407_v36 = vsel %vm406_vm7, %v1066_v29, %v403_v35  ;;  %v495_v29 = vperm.slane %v1357_v2, 5 }
 0x158   : > { %v408_v37 = vmul.f32 %v407_v36, %v392_v24 }
 0x15a   : > { %v413_v39 = vsel %vm410_vm8, %v408_v37, %v387_v22 }
 0x15b   : > { %v416_v40 = vmul.f32 0.95, %v413_v39 }
 0x15d   : > { %v418_v41 = vadd.f32 %v417_v38, %v416_v40 }
 0x15f   : > { %v419_v42 = vmul.f32 %v418_v41, %v418_v41 }
 0x161   : > { %v420_v43 = vsel %vm306_vm0, %v419_v42, 0.0  ;;  %v513_v42 = vstv %s493_s29  ;;  %s832_s29 = sshll.u32 %s1421_s11, 4  ;;  %s833_s29 = int_to_ptr.vmem [resolvable:$true] %s832_s29 }
 0x162   : > { %421 = vadd.xlane.f32.xlu1 %v420_v43 }
 0x1d5   : > { %v422_v44 = vpop.xlane.xlu1 %421 }
 0x1d6   : > { %v423_v45 = vmax.f32 %v422_v44, 1e-24 }
 0x1d8   : > { %1067 = vrsqrt.f32 %v423_v45  ;;  %vm430_vm10 = vweird.f32 %v423_v45 }
 0x1de   : > { %v1068_v46 = vpop.eup %1067 }
 0x1df   : > { %v425_v47 = vmul.f32 %v1068_v46, %v423_v45  ;;  %vm431_vm9 = vweird.f32 %v1068_v46 }
 0x1e0   : > { %vm432_vm11 = vmor %vm430_vm10, %vm431_vm9  ;;  %vm514_vm9 = vcmp.eq.s32.totalorder %v1373_v16, %v513_v42 }
 0x1e1   : > { %v426_v48 = vmul.f32 %v1068_v46, %v425_v47 }
 0x1e3   : > { %v427_v49 = vmul.f32 0.5, %v426_v48 }
 0x1e5   : > { %v428_v50 = vsub.f32 1.5, %v427_v49 }
 0x1e7   : > { %v429_v52 = vmul.f32 %v1068_v46, %v428_v50 }
 0x1e9   : > { %v433_v53 = vsel %vm432_vm11, %v1068_v46, %v429_v52  ;;  %v521_v46 = vperm.slane %v1357_v2, 6  ;;  %v624_v52 = vld [vmem:[%s296_s15] sm:$0xff]  ;;  %s1149_s15 = sshra.s32 %s835_s7, 4  ;;  %s1150_s15 = int_to_ptr.hbm [resolvable:$true] %s1149_s15 }
 0x1ea   : > { %v434_v54 = vmul.f32 %v433_v53, %v418_v41  ;;  %s1151_s10 = scalar_lea.hbm %s1150_s15, 8  ;;  %p1156_p2 = scmp.lt.s32.totalorder %s1150_s15, %s1497_s6 }
 0x1eb   : > { %p1152_p6 = scmp.ne.s32.totalorder %s1150_s15, %s1151_s10  ;;  %p1157_p3 = scmp.lt.s32.totalorder %s1155_s17, %s1151_s10 }
 0x1ec   : > { %v439_v56 = vsel %vm436_vm12, %v434_v54, %v413_v39  ;;  %v1206_v54 = vmov 0  }
 0x1ed   : > { %v442_v57 = vmul.f32 0.95, %v439_v56  ;;  %1060 = vset.pattern.permute.xlu0 %v1206_v54  ;;  %p1153_p13 = pnand %p1152_p6, %p1297_p10  ;;  %p1158_p4 = por %p1157_p3, %p1156_p2 }
 0x1ef   : > { %v444_v58 = vadd.f32 %v443_v55, %v442_v57  ;;  %v1207_v55 = vmov 1   ;;  %p1154_p0 = pneg %p1153_p13 }
 0x1f0   : > { %1061 = vset.pattern.permute.xlu1 %v1207_v55 }
 0x1f1   : > { %v445_v59 = vmul.f32 %v444_v58, %v444_v58  ;;  %p1159_p5 = pnand %p1158_p4, %p1154_p0 }
 0x1f3   : > { %v446_v60 = vsel %vm306_vm0, %v445_v59, 0.0 }
 0x1f4   : > { %447 = vadd.xlane.f32.xlu1 %v446_v60 }
 0x267   : > { %v448_v61 = vpop.xlane.xlu1 %447 }
 0x268   : > { %v449_v62 = vmax.f32 %v448_v61, 1e-24 }
 0x26a   : > { %1069 = vrsqrt.f32 %v449_v62  ;;  %vm456_vm14 = vweird.f32 %v449_v62 }
 0x270   : > { %v1070_v63 = vpop.eup %1069 }
 0x271   : > { %v451_v1 = vmul.f32 %v1070_v63, %v449_v62  ;;  %vm457_vm13 = vweird.f32 %v1070_v63  ;;  %v539_v62 = vstv %s519_s16 }
 0x272   : > { %vm458_vm15 = vmor %vm456_vm14, %vm457_vm13  ;;  %vm540_vm13 = vcmp.eq.s32.totalorder %v1373_v16, %v539_v62  ;;  %vm336_vm14 = vcmask 64512  }
 0x273   : > { %v452_v3 = vmul.f32 %v1070_v63, %v451_v1 }
 0x275   : > { %v453_v4 = vmul.f32 0.5, %v452_v3 }
 0x277   : > { %v454_v5 = vsub.f32 1.5, %v453_v4  ;;  %v547_v4 = vperm.slane %v1357_v2, 7 }
 0x279   : > { %v455_v7 = vmul.f32 %v1070_v63, %v454_v5 }
 0x27b   : > { %v459_v8 = vsel %vm458_vm15, %v1070_v63, %v455_v7 }
 0x27c   : > { %v460_v9 = vmul.f32 %v459_v8, %v444_v58 }
 0x27e   : > { %v465_v11 = vsel %vm462_vm1, %v460_v9, %v439_v56 }
 0x27f   : > { %v468_v12 = vmul.f32 0.95, %v465_v11 }
 0x281   : > { %v470_v14 = vadd.f32 %v469_v10, %v468_v12  ;;  %v1407_v10 = vand.u32 127, %v334_v13  ;;  %v1208_v12 = vmov 0.0  }
 0x283   : > { %v471_v15 = vmul.f32 %v470_v14, %v470_v14 }
 0x285   : > { %v472_v17 = vsel %vm306_vm0, %v471_v15, 0.0 }
 0x286   : > { %473 = vadd.xlane.f32.xlu2 %v472_v17 }
 0x2f9   : > { %v474_v18 = vpop.xlane.xlu2 %473 }
 0x2fa   : > { %v475_v19 = vmax.f32 %v474_v18, 1e-24 }
 0x2fc   : > { %1071 = vrsqrt.f32 %v475_v19  ;;  %vm482_vm3 = vweird.f32 %v475_v19 }
 0x302   : > { %v1072_v20 = vpop.eup %1071 }
 0x303   : > { %v477_v21 = vmul.f32 %v1072_v20, %v475_v19  ;;  %vm483_vm2 = vweird.f32 %v1072_v20 }
 0x304   : > { %vm484_vm4 = vmor %vm482_vm3, %vm483_vm2 }
 0x305   : > { %v478_v22 = vmul.f32 %v1072_v20, %v477_v21  ;;  %v565_v21 = vstv %s545_s19 }
 0x307   : > { %v479_v23 = vmul.f32 0.5, %v478_v22 }
 0x309   : > { %v480_v24 = vsub.f32 1.5, %v479_v23 }
 0x30b   : > { %v481_v26 = vmul.f32 %v1072_v20, %v480_v24 }
 0x30d   : > { %v485_v27 = vsel %vm484_vm4, %v1072_v20, %v481_v26  ;;  %vm566_vm4 = vcmp.eq.s32.totalorder %v1373_v16, %v565_v21 }
 0x30e   : > { %v486_v28 = vmul.f32 %v485_v27, %v470_v14 }
 0x310   : > { %v491_v30 = vsel %vm488_vm5, %v486_v28, %v465_v11  ;;  %v688_v28 = vpop.f32.mrf.mxu3 }
 0x311   : > { %v494_v31 = vmul.f32 0.95, %v491_v30 }
 0x313   : > { %v496_v32 = vadd.f32 %v495_v29, %v494_v31  ;;  %v691_v31 = vmul.f32 10.0, %v688_v28 }
 0x315   : > { %v497_v33 = vmul.f32 %v496_v32, %v496_v32 }
 0x317   : > { %v498_v34 = vsel %vm306_vm0, %v497_v33, 0.0 }
 0x318   : > { %499 = vadd.xlane.f32.xlu2 %v498_v34 }
 0x38b   : > { %v500_v35 = vpop.xlane.xlu2 %499 }
 0x38c   : > { %v501_v36 = vmax.f32 %v500_v35, 1e-24  ;;  %v330_v35 = vpop.f32.mrf.mxu0 }
 0x38e   : > { %1073 = vrsqrt.f32 %v501_v36  ;;  %vm508_vm7 = vweird.f32 %v501_v36 }
 0x394   : > { %v1074_v37 = vpop.eup %1073 }
 0x395   : > { %v503_v38 = vmul.f32 %v1074_v37, %v501_v36  ;;  %vm509_vm6 = vweird.f32 %v1074_v37 }
 0x396   : > { %vm510_vm8 = vmor %vm508_vm7, %vm509_vm6 }
 0x397   : > { %v504_v39 = vmul.f32 %v1074_v37, %v503_v38 }
 0x399   : > { %v505_v40 = vmul.f32 0.5, %v504_v39 }
 0x39b   : > { %v506_v41 = vsub.f32 1.5, %v505_v40 }
 0x39d   : > { %v507_v43 = vmul.f32 %v1074_v37, %v506_v41 }
 0x39f   : > { %v511_v44 = vsel %vm510_vm8, %v1074_v37, %v507_v43 }
 0x3a0   : > { %v512_v45 = vmul.f32 %v511_v44, %v496_v32  ;;  %v746_v32 = vsel %vm336_vm14, %v691_v31, -inf }
 0x3a2   : > { %v517_v47 = vsel %vm514_vm9, %v512_v45, %v491_v30  ;;  %vm357_vm9 = vcmask 7168  }
 0x3a3   : > { %v520_v48 = vmul.f32 0.95, %v517_v47 }
 0x3a5   : > { %v522_v49 = vadd.f32 %v521_v46, %v520_v48 }
 0x3a7   : > { %v523_v50 = vmul.f32 %v522_v49, %v522_v49 }
 0x3a9   : > { %v524_v51 = vsel %vm306_vm0, %v523_v50, 0.0 }
 0x3aa   : > { %525 = vadd.xlane.f32.xlu0 %v524_v51 }
 0x3be   : > { %626 = vperm.xlu0 %1060, %v624_v52  }
 0x3c6   : > { %1062 = vset.pattern.permute.xlu0 %v1207_v55 }
 0x41d   : > { %v526_v53 = vpop.xlane.xlu0 %525 }
 0x41e   : > { %v527_v56 = vmax.f32 %v526_v53, 1e-24 }
 0x420   : > { %1075 = vrsqrt.f32 %v527_v56  ;;  %vm534_vm11 = vweird.f32 %v527_v56 }
 0x426   : > { %v1076_v57 = vpop.eup %1075 }
 0x427   : > { %v529_v58 = vmul.f32 %v1076_v57, %v527_v56  ;;  %vm535_vm10 = vweird.f32 %v1076_v57 }
 0x428   : > { %vm536_vm12 = vmor %vm534_vm11, %vm535_vm10 }
 0x429   : > { %v530_v59 = vmul.f32 %v1076_v57, %v529_v58 }
 0x42b   : > { %v531_v60 = vmul.f32 0.5, %v530_v59 }
 0x42d   : > { %v532_v61 = vsub.f32 1.5, %v531_v60 }
 0x42f   : > { %v533_v63 = vmul.f32 %v1076_v57, %v532_v61 }
 0x430   : > { %v627_v11 = vpop.permute.xlu0 %626 }
 0x431   : > { %v537_v1 = vsel %vm536_vm12, %v1076_v57, %v533_v63  ;;  %vm628_vm15 = vcmp.eq.s32.totalorder %v627_v11, %v1407_v10 }
 0x432   : > { %v538_v3 = vmul.f32 %v537_v1, %v522_v49  ;;  %v1410_v14 = vsel %vm628_vm15, 1.0, %v1208_v12 }
 0x433   : > { %994 = vmatpush.xpose.msk.msrb.mxu0 %vm336_vm14, %v1410_v14 }
 0x434   : > { %v543_v5 = vsel %vm540_vm13, %v538_v3, %v517_v47 }
 0x435   : > { %v546_v6 = vmul.f32 0.95, %v543_v5 }
 0x436   : > { %995 = vmatmul.msk.f32.vlgmr.msrb.gmra.mxu0 %vm336_vm14, %v1410_v14 }
 0x437   : > { %v548_v7 = vadd.f32 %v547_v4, %v546_v6 }
 0x439   : > { %v549_v8 = vmul.f32 %v548_v7, %v548_v7 }
 0x43b   : > { %v550_v9 = vsel %vm306_vm0, %v549_v8, 0.0 }
 0x43c   : > { %551 = vadd.xlane.f32.xlu1 %v550_v9 }
 0x455   : > { %716 = vperm.xlu1 %1061, %v624_v52  }
 0x4af   : > { %v552_v2 = vpop.xlane.xlu1 %551 }
 0x4b0   : > { %v553_v15 = vmax.f32 %v552_v2, 1e-24 }
 0x4b2   : > { %1077 = vrsqrt.f32 %v553_v15  ;;  %vm560_vm2 = vweird.f32 %v553_v15 }
 0x4b3   : > { %v712_v43 = vpop.f32.mrf.mxu0 }
 0x4b4   : > { %v744_v45 = vsub.f32 1.0, %v712_v43 }
 0x4b8   : > { %v1078_v17 = vpop.eup %1077 }
 0x4b9   : > { %v555_v13 = vmul.f32 %v1078_v17, %v553_v15  ;;  %vm561_vm1 = vweird.f32 %v1078_v17 }
 0x4ba   : > { %vm562_vm3 = vmor %vm560_vm2, %vm561_vm1 }
 0x4bb   : > { %v556_v18 = vmul.f32 %v1078_v17, %v555_v13 }
 0x4bd   : > { %v557_v19 = vmul.f32 0.5, %v556_v18 }
 0x4bf   : > { %v558_v20 = vsub.f32 1.5, %v557_v19 }
 0x4c1   : > { %v559_v22 = vmul.f32 %v1078_v17, %v558_v20 }
 0x4c3   : > { %v563_v23 = vsel %vm562_vm3, %v1078_v17, %v559_v22 }
 0x4c4   : > { %v564_v24 = vmul.f32 %v563_v23, %v548_v7 }
 0x4c6   : > { %v569_v25 = vsel %vm566_vm4, %v564_v24, %v543_v5  ;;  %v333_v5 = vmul.f32 10.0, %v330_v35 }
 0x4c7   : > { %986 = vmatpush.xpose.msk.msra.mxu1 %vm306_vm0, %v569_v25  ;;  %v631_v26 = vmul.f32 %v569_v25, %v569_v25  ;;  %v717_v27 = vpop.permute.xlu1 %716  ;;  %570 = vst.msk [vmem:[%s1421_s11] sm:$0xff] %vm306_vm0, %v569_v25 }
 0x4c8   : > { %vm718_vm5 = vcmp.eq.s32.totalorder %v717_v27, %v1407_v10  ;;  %v337_v6 = vsel %vm336_vm14, %v333_v5, -inf }
 0x4c9   : > { %v632_v29 = vsel %vm306_vm0, %v631_v26, 0.0  ;;  %v996_v30 = vsel %vm718_vm5, 1.0, %v1208_v12  ;;  %v1209_v26 = vmov 8.0  }
 0x4ca   : > { %633 = vadd.xlane.f32.xlu2 %v632_v29  ;;  %987 = vmatmul.msk.f32.vlgmr.msra.gmra.mxu1 %vm306_vm0, %v569_v25 }
 0x4cb   : > { %997 = vmatpush.xpose.msk.msrb.mxu1 %vm336_vm14, %v996_v30 }
 0x4d2   : > { %998 = vmatmul.msk.f32.vlgmr.msrb.gmra.mxu1 %vm336_vm14, %v996_v30  ;;  %747 = vmax.xlane.f32.xlu2 %v746_v32 }
 0x53d   : > { %v634_v33 = vpop.xlane.xlu2 %633 }
 0x53e   : > { %v635_v34 = vmax.f32 %v634_v33, 1e-24 }
 0x540   : > { %1079 = vrsqrt.f32 %v635_v34  ;;  %vm642_vm7 = vweird.f32 %v635_v34 }
 0x545   : > { %v748_v36 = vpop.xlane.xlu2 %747 }
 0x546   : > { %v1080_v37 = vpop.eup %1079  ;;  %v750_v38 = vsub.f32 %v691_v31, %v748_v36 }
 0x547   : > { %v637_v39 = vmul.f32 %v1080_v37, %v635_v34  ;;  %v591_v40 = vpop.f32.mrf.mxu1  ;;  %vm643_vm6 = vweird.f32 %v1080_v37 }
 0x548   : > { %v760_v41 = vmul.f32 1.442695, %v750_v38  ;;  %vm644_vm8 = vmor %vm642_vm7, %vm643_vm6  ;;  %v594_v57 = vmul.f32 10.0, %v591_v40 }
 0x549   : > { %v638_v42 = vmul.f32 %v1080_v37, %v637_v39 }
 0x54a   : > { %1081 = vpow2.f32 %v760_v41  ;;  %v596_v61 = vmul.f32 1.442695, %v594_v57 }
 0x54b   : > { %v639_v44 = vmul.f32 0.5, %v638_v42 }
 0x54d   : > { %v640_v46 = vsub.f32 1.5, %v639_v44 }
 0x54f   : > { %v641_v47 = vmul.f32 %v1080_v37, %v640_v46  ;;  %v741_v48 = vpop.f32.mrf.mxu1 }
 0x550   : > { %v1082_v49 = vpop.eup %1081  ;;  %v745_v50 = vmul.f32 %v744_v45, %v741_v48 }
 0x551   : > { %v645_v51 = vsel %vm644_vm8, %v1080_v37, %v641_v47 }
 0x552   : > { %v646_v52 = vmul.f32 %v645_v51, %v569_v25  ;;  %v762_v53 = vmul.f32 %v1082_v49, %v745_v50 }
 0x554   : > { %990 = vmatpush.xpose.msk.msra.mxu2 %vm306_vm0, %v646_v52  ;;  %v763_v54 = vsel %vm336_vm14, %v762_v53, 0.0 }
 0x555   : > { %764 = vadd.xlane.f32.xlu2 %v763_v54 }
 0x557   : > { %991 = vmatmul.msk.f32.vlgmr.msra.gmra.mxu2 %vm306_vm0, %v1354_v0  ;;  %vm595_vm0 = vcmp.eq.s32.totalorder %v1373_v16, %v1407_v10 }
 0x5c8   : > { %v765_v7 = vpop.xlane.xlu2 %764 }
 0x5da   : > { %v667_v55 = vpop.f32.mrf.mxu2 }
 0x5db   : > { %v670_v56 = vmul.f32 10.0, %v667_v55 }
 0x5dd   : > { %v749_v58 = vsub.f32 %v670_v56, %v748_v36 }
 0x5df   : > { %v755_v59 = vmul.f32 1.442695, %v749_v58  ;;  %v751_v60 = vmul.f32 %v1410_v14, %v749_v58 }
 0x5e1   : > { %1083 = vpow2.f32 %v755_v59  ;;  %v752_v62 = vsel %vm336_vm14, %v751_v60, 0.0 }
 0x5e2   : > { %753 = vadd.xlane.f32.xlu1 %v752_v62  ;;  %1085 = vpow2.f32 %v596_v61 }
 0x5e7   : > { %v1084_v63 = vpop.eup %1083 }
 0x5e8   : > { %v757_v1 = vsel %vm336_vm14, %v1084_v63, 0.0  ;;  %v1086_v3 = vpop.eup %1085 }
 0x5e9   : > { %758 = vadd.xlane.f32.xlu2 %v757_v1  ;;  %v598_v0 = vsel %vm595_vm0, 0.0, %v1086_v3 }
 0x5ea   : > { %v599_v4 = vsel %vm336_vm14, %v598_v0, 0.0 }
 0x5f1   : > { %600 = vadd.xlane.f32.xlu2 %v599_v4 }
 0x5f9   : > { %338 = vmax.xlane.f32.xlu2 %v337_v6 }
 0x655   : > { %v754_v15 = vpop.xlane.xlu1 %753 }
 0x65c   : > { %v759_v8 = vpop.xlane.xlu2 %758 }
 0x65d   : > { %v766_v9 = vadd.f32 %v765_v7, %v759_v8 }
 0x65f   : > { %v767_v11 = vadd.f32 1e-08, %v766_v9 }
 0x661   : > { %1087 = vlog2.f32 %v767_v11 }
 0x664   : > { %v601_v12 = vpop.xlane.xlu2 %600 }
 0x665   : > { %1089 = vlog2.f32 %v601_v12 }
 0x666   : > { %1091 = vrcp.f32 %v1209_v26 }
 0x667   : > { %v1088_v14 = vpop.eup %1087 }
 0x668   : > { %v769_v2 = vmul.f32 0.6931472, %v1088_v14 }
 0x66a   : > { %v770_v16 = vsub.f32 %v754_v15, %v769_v2 }
 0x66b   : > { %v1090_v17 = vpop.eup %1089 }
 0x66c   : > { %v603_v13 = vmul.f32 0.6931472, %v1090_v17  ;;  %v339_v18 = vpop.xlane.xlu2 %338  ;;  %v771_v19 = vsel %vm357_vm9, %v770_v16, 0.0  ;;  %v1092_v27 = vpop.eup %1091 }
 0x66d   : > { %vm340_vm10 = vcmp.ge.f32.partialorder %v333_v5, %v339_v18  ;;  %772 = vadd.xlane.f32.xlu2 %v771_v19  ;;  %v616_v28 = vmul.f32 8.0, %v1092_v27 }
 0x66e   : > { %v341_v20 = vsel %vm340_vm10, %v1407_v10, 8  ;;  %v988_v21 = vadd.f32 -1.9459101, %v603_v13 }
 0x66f   : > { %v342_v22 = vsel %vm336_vm14, %v341_v20, 2147483647  ;;  %v617_v32 = vsub.f32 1.0, %v616_v28 }
 0x670   : > { %v605_v23 = vsel %vm357_vm9, %v988_v21, 0.0  ;;  %v344_v24 = vshra.s32 %v342_v22, 16  ;;  %v343_v34 = vand.u32 65535, %v342_v22 }
 0x671   : > { %606 = vadd.xlane.f32.xlu0 %v605_v23 }
 0x672   : > { %v346_v25 = vcvt.s32.f32 %v344_v24 }
 0x675   : > { %347 = vmin.xlane.f32.xlu2 %v346_v25 }
 0x6e0   : > { %v773_v29 = vpop.xlane.xlu2 %772 }
 0x6e1   : > { %v774_v30 = vrot.slane %v773_v29, 4 }
 0x6e3   : > { %v775_v31 = vadd.f32 %v774_v30, %v773_v29 }
 0x6e4   : > { %v607_v33 = vpop.xlane.xlu0 %606 }
 0x6e5   : > { %v776_v35 = vrot.slane %v775_v31, 2  ;;  %v608_v36 = vrot.slane %v607_v33, 4 }
 0x6e6   : > { %1162 = shalt.err (!%p1159_p5)
}
 0x6e7   : > { %1011 = dma.vmem_to_hbm [thread:$0]  (%p1297_p10), %s833_s29, 128, %s835_s7, %s814_s8   ;;  %v609_v37 = vadd.f32 %v608_v36, %v607_v33  ;;  %v618_v38 = vmul.f32 %v1092_v27, %v617_v32  ;;  %v345_v40 = vcvt.s32.f32 %v343_v34  ;;  %v777_v42 = vadd.f32 %v776_v35, %v775_v31 }
 0x6e8   : > { %v348_v39 = vpop.xlane.xlu2 %347  ;;  %vm620_vm12 = vweird.f32 %v1092_v27  ;;  %vm796_vm13 = vcmp.eq.s32.totalorder %v1407_v10, 1  ;;  %vm793_vm14 = vcmp.eq.s32.totalorder %v1407_v10, 0  ;;  %vm800_vm15 = vcmp.eq.s32.totalorder %v1407_v10, 2  ;;  %s299_s10 = scalar_lea.vmem %s1495_s4, %s1345_s20  ;;  %s303_s17 = scalar_lea.vmem %s1496_s5, %s1348_s22 }
 0x6e9   : > { %v610_v41 = vrot.slane %v609_v37, 2  ;;  %vm349_vm11 = vcmp.eq.f32.partialorder %v346_v25, %v348_v39  ;;  %v619_v45 = vadd.f32 %v1092_v27, %v618_v38  ;;  %v778_v47 = vrot.slane %v777_v42, 1 }
 0x6ea   : > { %v350_v43 = vsel %vm349_vm11, %v345_v40, inf  ;;  %vm804_vm1 = vcmask 16384   ;;  %v354_v59 = vcvt.f32.s32 %v348_v39 }
 0x6eb   : > { %351 = vmin.xlane.f32.xlu2 %v350_v43  ;;  %v611_v44 = vadd.f32 %v610_v41, %v609_v37  ;;  %v621_v49 = vsel %vm620_vm12, %v1092_v27, %v619_v45  ;;  %v779_v50 = vadd.f32 %v778_v47, %v777_v42 }
 0x6ec   : > { %v355_v61 = vshll.u32 %v354_v59, 16 }
 0x6ed   : > { %v612_v46 = vrot.slane %v611_v44, 1 }
 0x6ef   : > { %v613_v48 = vadd.f32 %v612_v46, %v611_v44 }
 0x6f1   : > { %1003 = vpush %v613_v48 }
 0x6f2   : > { %1005 = vpush %v621_v49 }
 0x6f3   : > { %1007 = vpush %v779_v50 }
 0x722   : > { %s1004_s12 = spop %1003 }
 0x723   : > { %s1006_s14 = spop %1005 }
 0x724   : > { %s1008_s18 = spop %1007  ;;  %s623_s23 = smul.f32 %s1006_s14, %s1004_s12 }
 0x725   : > { %s789_s21 = smul.f32 %s1008_s18, %s1006_s14 }
 0x726   : > { %v797_v51 = vstv %s623_s23 }
 0x727   : > { %s790_s24 = smul.f32 -1.0, %s789_s21  ;;  %v798_v54 = vsel %vm796_vm13, %v797_v51, 0.0 }
 0x729   : > { %s791_s29 = smul.f32 2.0, %s790_s24  ;;  %v801_v53 = vstv %s790_s24 }
 0x72a   : > { %v802_v57 = vsel %vm800_vm15, %v801_v53, 0.0 }
 0x72b   : > { %s792_s7 = sadd.f32 %s791_s29, %s623_s23 }
 0x72d   : > { %v794_v52 = vstv %s792_s7 }
 0x72e   : > { %v795_v55 = vsel %vm793_vm14, %v794_v52, 0.0 }
 0x72f   : > { %v799_v56 = vadd.f32 %v798_v54, %v795_v55 }
 0x731   : > { %v803_v58 = vadd.f32 %v802_v57, %v799_v56 }
 0x733   : > { %805 = vst.msk [vmem:[%s299_s10] sm:$0x1] %vm804_vm1, %v803_v58 }
 0x75e   : > { %v352_v60 = vpop.xlane.xlu2 %351 }
 0x75f   : > { %v353_v62 = vcvt.f32.s32 %v352_v60 }
 0x761   : > { %v356_v10 = vadd.s32 %v355_v61, %v353_v62 }
 0x763   : > { %358 = vst.msk [vmem:[%s303_s17] sm:$0xff] %vm357_vm9, %v356_v10 }
 0x764 PF: > { %p1022_p10 = scmp.ge.s32.totalorder %s1203_s28, 2  ;;  %s859_s20 = sand.u32 1, %s1191_s25  }
 0x765   : > { %s860_s19 = scalar_lea.sflag [#allocation6], %s859_s20 }
 0x766   : > { %p1018_p7 = pnand %p1022_p10, %p1301_p11 }
 0x768   : > { %p1019_p8 = pneg %p1018_p7 }
 0x76a   : > { %1186 = dma.done.wait (%p1019_p8), %s860_s19, 128  }
 0x76b   : > { %1188 = vsyncadd (%p1019_p8), %s860_s19, 4294967168  ;;  %p28_p9 = scmp.ge.s32.totalorder %s1273_s30, 6   ;;  %s1503_s25 = smov %s1195_s26 }
 0x76c   : > { %s1504_s26 = smov %s1199_s27  ;;  %s1505_s27 = smov %s1285_s9 }
 0x76d   : > { %s1506_s28 = smov %s1273_s30  ;;  %30 = sbr.rel (!%p28_p9) target bundleno = 11 (0xb), region = 107 }
 0x772   :  { %866 = vsyncpa [#allocation5], 1 }
 0x773   :  { %868 = vsyncpa [#allocation5 + $0x1], 1 }
 0x774   :  { %869 = vsyncpa [#allocation6], 1 }
 0x775   :  { %871 = vsyncpa [#allocation6 + $0x1], 1 }

</bundles_post_ra>
